<compile_context>
chip_gen: v5e
topology: v5e:2x2
jax: 0.10.0
libtpu: 0.0.40
codegen_flags: <defaults>
</compile_context>

<pallas_src>
import functools

import jax
import jax.numpy as jnp
from jax import lax
from jax.experimental import pallas as pl
from jax.experimental.pallas import tpu as pltpu


# --------------------------- roll-direction probe ----------------------------

def _probe_roll_kernel(x_ref, o_ref):
    o_ref[...] = pltpu.roll(x_ref[...], 1, axis=1)


@functools.lru_cache(maxsize=None)
def _roll_shift_sign():
    """+1 if pltpu.roll follows jnp.roll's shift convention, -1 otherwise."""
    x = jnp.tile(jnp.arange(128, dtype=jnp.float32)[None, :], (8, 1))
    y = pl.pallas_call(
        _probe_roll_kernel,
        out_shape=jax.ShapeDtypeStruct((8, 128), jnp.float32))(x)
    return 1 if bool(jnp.all(y == jnp.roll(x, 1, axis=1))) else -1


# ------------------------------ Pallas kernel --------------------------------

def _refine_block_kernel(x_ref,
                         w1_ref, s1_ref, b1_ref,
                         w2_ref, s2_ref, b2_ref,
                         w3_ref, s3_ref, b3_ref,
                         out_ref, im_ref, *, H, W, roll_sign):
    """Fused RefineNetBlock for one grid step (a group of images folded into lanes).

    x_ref:   (1, Cin, L)    f32; channels on sublanes, L = n_fold*H*W on lanes
    w*_ref:  (Cout, 9*Cin)  packed 3x3 weights (k-major, cin-minor), MXU dtype
    s*/b*:   (Cout, 1)      folded BN (+conv bias) scale / bias, f32
    out_ref: (1, Cout, L)   f32
    im_ref:  (9*Cmax, L)    im2col staging scratch, MXU dtype
    """
    L = x_ref.shape[-1]

    # Per-tap boundary masks, built once from iota and shared by all 3 layers.
    lane = lax.broadcasted_iota(jnp.int32, (1, L), 1)
    xc = lane % W                  # column inside the image
    yr = (lane // W) % H           # row inside the image (repeats per folded image)
    masks = []
    for k in range(9):
        dy, dx = k // 3 - 1, k % 3 - 1
        conds = []
        if dx == -1:
            conds.append(xc >= 1)
        if dx == +1:
            conds.append(xc <= W - 2)
        if dy == -1:
            conds.append(yr >= 1)
        if dy == +1:
            conds.append(yr <= H - 2)
        if conds:
            m = conds[0]
            for c in conds[1:]:
                m = m & c
            masks.append(m.astype(jnp.float32))
        else:
            masks.append(None)      # center tap: never crosses a boundary

    def conv_bn(act, w_ref, s_ref, b_ref):
        """act: (Cin, L) f32 -> 3x3 SAME conv + folded BN -> (Cout, L) f32."""
        cin = act.shape[0]
        # im2col: 9 rolled+masked copies of the activation, staged k-major /
        # cin-minor so the whole layer is ONE (Cout,9Cin)x(9Cin,L) MXU matmul.
        for k in range(9):
            dy, dx = k // 3 - 1, k % 3 - 1
            d = dy * W + dx                       # flat-index displacement
            if d == 0:
                sh = act
            else:
                shift = ((-d) if roll_sign > 0 else d) % L
                sh = pltpu.roll(act, shift, axis=1)
            if masks[k] is not None:
                sh = sh * masks[k]
            im_ref[k * cin:(k + 1) * cin, :] = sh.astype(im_ref.dtype)
        acc = jnp.dot(w_ref[...], im_ref[0:9 * cin, :],
                      preferred_element_type=jnp.float32)
        return acc * s_ref[...] + b_ref[...]

    x0 = x_ref[0]                                  # (Cin, L) f32
    h = conv_bn(x0, w1_ref, s1_ref, b1_ref)
    h = jnp.where(h >= 0, h, 0.3 * h)              # LeakyReLU(0.3)
    h = conv_bn(h, w2_ref, s2_ref, b2_ref)
    h = jnp.where(h >= 0, h, 0.3 * h)
    h = conv_bn(h, w3_ref, s3_ref, b3_ref)
    h = h + x0                                     # residual (in_ch == out_ch)
    h = jnp.where(h >= 0, h, 0.3 * h)
    out_ref[0] = h.astype(out_ref.dtype)


# ------------------------------- JAX wrapper ---------------------------------

def _default_grid_steps(n):
    """1 step on single-TC v5e/v6e (batch folded into lanes); 2 on dual-TC v7x."""
    try:
        kind = jax.devices()[0].device_kind.lower()
    except Exception:
        return 1
    if "v7" in kind or "tpu7" in kind:
        return 2 if (n >= 2 and n % 2 == 0) else 1
    return 1


def refine_net_block(x_nchw, params, *, compute_dtype=jnp.float32, grid_steps=None):
    """Forward pass of RefineNetBlock. Input/output NCHW (like PyTorch)."""
    N, C, H, W = x_nchw.shape
    HW = H * W
    assert HW % 128 == 0, "flattened spatial dim must be a multiple of 128 lanes"
    p1, p2, p3 = params["layer1"], params["layer2"], params["layer3"]
    w1, s1, b1 = p1["w"], p1["scale"], p1["bias"]
    w2, s2, b2 = p2["w"], p2["scale"], p2["bias"]
    w3, s3, b3 = p3["w"], p3["scale"], p3["bias"]
    c1, c2, c_out = w1.shape[0], w2.shape[0], w3.shape[0]
    assert w1.shape[1] == 9 * C and c_out == C, "residual requires out_ch == in_ch"
    c_in_max = max(C, c1, c2)                      # max conv INPUT channels

    if grid_steps is None:
        grid_steps = _default_grid_steps(N)
    if N % grid_steps != 0:
        grid_steps = 1
    nb = N // grid_steps
    L = nb * HW                                    # lanes per grid step

    # MXU operand dtype (bf16 is the native MXU input on v6e/v7x).
    w1c, w2c, w3c = (w.astype(compute_dtype) for w in (w1, w2, w3))

    # Fold the batch into the lane axis: (steps, C, nb*H*W), images contiguous.
    x_folded = (x_nchw.astype(jnp.float32)
                .reshape(grid_steps, nb, C, HW)
                .transpose(0, 2, 1, 3)
                .reshape(grid_steps, C, L))

    kernel = functools.partial(_refine_block_kernel, H=H, W=W,
                               roll_sign=_roll_shift_sign())
    out = pl.pallas_call(
        kernel,
        out_shape=jax.ShapeDtypeStruct((grid_steps, c_out, L), jnp.float32),
        grid=(grid_steps,),
        in_specs=[
            pl.BlockSpec((1, C, L), lambda g: (g, 0, 0)),          # x slab
            pl.BlockSpec(w1c.shape, lambda g: (0, 0)),
            pl.BlockSpec(s1.shape, lambda g: (0, 0)),
            pl.BlockSpec(b1.shape, lambda g: (0, 0)),
            pl.BlockSpec(w2c.shape, lambda g: (0, 0)),
            pl.BlockSpec(s2.shape, lambda g: (0, 0)),
            pl.BlockSpec(b2.shape, lambda g: (0, 0)),
            pl.BlockSpec(w3c.shape, lambda g: (0, 0)),
            pl.BlockSpec(s3.shape, lambda g: (0, 0)),
            pl.BlockSpec(b3.shape, lambda g: (0, 0)),
        ],
        out_specs=pl.BlockSpec((1, c_out, L), lambda g: (g, 0, 0)),
        scratch_shapes=[pltpu.VMEM((9 * c_in_max, L), compute_dtype)],  # im2col
        compiler_params=pltpu.CompilerParams(
            dimension_semantics=("parallel",)),     # 2 TCs on v7x each take a step
    )(x_folded, w1c, s1, b1, w2c, s2, b2, w3c, s3, b3)

    # TODO(synk): add a spatial-row-tile grid axis (1-row halo) before scaling
    # H*W toward v7x's 64 MiB/TC VMEM; at 16x16 everything fits untiled.
    return (out.reshape(grid_steps, c_out, nb, HW)
            .transpose(0, 2, 1, 3)
            .reshape(N, c_out, H, W))


# -------------------------------- parameters ---------------------------------

def _fold_bn(conv_bias, gamma, beta, running_mean, running_var, eps=1e-5):
    """Fold inference-mode BatchNorm + conv bias into per-channel scale/bias."""
    scale = gamma * lax.rsqrt(running_var + eps)
    bias = (conv_bias - running_mean) * scale + beta
    return scale, bias


def make_refine_net_params(key, in_ch, mid1, mid2, out_ch):
    """Deterministic synthetic params. Returns (packed-for-kernel, raw-for-ref)."""
    ks = jax.random.split(key, 12)
    packed, raw = {}, {}
    for i, (cin, cout) in enumerate([(in_ch, mid1), (mid1, mid2), (mid2, out_ch)]):
        kw, kb, kbn = ks[4 * i], ks[4 * i + 1], ks[4 * i + 2]
        w = 0.1 * jax.random.normal(kw, (cout, cin, 3, 3), jnp.float32)    # OIHW
        b = 0.1 * jax.random.normal(kb, (cout,), jnp.float32)
        k1, k2, k3, k4 = jax.random.split(kbn, 4)
        gamma = 1.0 + 0.1 * jax.random.normal(k1, (cout,), jnp.float32)
        beta = 0.1 * jax.random.normal(k2, (cout,), jnp.float32)
        rmean = 0.1 * jax.random.normal(k3, (cout,), jnp.float32)
        rvar = 1.0 + 0.1 * jax.random.uniform(k4, (cout,), jnp.float32)
        scale, bias = _fold_bn(b, gamma, beta, rmean, rvar)
        raw[f"w{i+1}"], raw[f"scale{i+1}"], raw[f"bias{i+1}"] = w, scale, bias
        # OIHW -> (Cout, ky, kx, Cin) -> (Cout, 9*Cin): K axis is k-major /
        # cin-minor, matching the im2col row order built in the kernel.
        w_packed = jnp.transpose(w, (0, 2, 3, 1)).reshape(cout, 9 * cin)
        packed[f"layer{i+1}"] = dict(w=w_packed, scale=scale.reshape(cout, 1),
                                     bias=bias.reshape(cout, 1))
    return packed, raw


# ------------------------------ reference (JAX) -------------------------------

def _ref_block(x_nchw, raw):
    def layer(x, w, scale, bias, res=None, act=True):
        y = lax.conv_general_dilated(
            x, w, window_strides=(1, 1), padding="SAME",
            dimension_numbers=("NCHW", "OIHW", "NCHW"),
            precision=lax.Precision.HIGHEST)
        y = y * scale.reshape(1, -1, 1, 1) + bias.reshape(1, -1, 1, 1)
        if res is not None:
            y = y + res
        if act:
            y = jnp.where(y >= 0, y, 0.3 * y)
        return y
    h = layer(x_nchw, raw["w1"], raw["scale1"], raw["bias1"])
    h = layer(h, raw["w2"], raw["scale2"], raw["bias2"])
    h = layer(h, raw["w3"], raw["scale3"], raw["bias3"], res=x_nchw)
    return h


# ----------------------------------- main -------------------------------------

if __name__ == "__main__":
    key = jax.random.PRNGKey(0)
    k_x, k_p = jax.random.split(key)

    N, C, H, W = 2, 4, 16, 16          # residual requires out_channels == in_channels
    mid1, mid2 = 8, 16

    x = jax.random.normal(k_x, (N, C, H, W), jnp.float32)
    packed, raw = make_refine_net_params(k_p, C, mid1, mid2, C)

    ref = jax.block_until_ready(_ref_block(x, raw))

    # f32 MXU operands (default path).
    out = jax.block_until_ready(refine_net_block(x, packed))
    assert out.shape == (N, C, H, W)
    assert jnp.allclose(out, ref, rtol=1e-2, atol=1e-2), \
        float(jnp.max(jnp.abs(out - ref)))

    # bf16 MXU operands (v6e/v7x lever); accumulation stays f32, looser tolerance.
    out_bf16 = jax.block_until_ready(
        refine_net_block(x, packed, compute_dtype=jnp.bfloat16))
    assert jnp.allclose(out_bf16, ref, rtol=5e-2, atol=1e-1), \
        float(jnp.max(jnp.abs(out_bf16 - ref)))

    print("KERNEL_OK")
</pallas_src>

<mosaic_0001>
module attributes {stable_mosaic.version = 11 : i64} {
  func.func @_probe_roll_kernel(%arg0: memref<8x128xf32, #tpu.memory_space<vmem>>, %arg1: memref<8x128xf32, #tpu.memory_space<vmem>>) attributes {dimension_semantics = [], scalar_prefetch = 0 : i64, scratch_operands = 0 : i64, tpu.core_type = #tpu.core_type<tc>} {
    %c0 = arith.constant 0 : index
    %c0_0 = arith.constant 0 : index
    %0 = vector.load %arg0[%c0, %c0_0] : memref<8x128xf32, #tpu.memory_space<vmem>>, vector<8x128xf32>
    %c1_i32 = arith.constant 1 : i32
    %1 = tpu.dynamic_rotate %0 by %c1_i32 dim 1 : vector<8x128xf32>, i32 -> vector<8x128xf32>
    %c0_1 = arith.constant 0 : index
    %c0_2 = arith.constant 0 : index
    %2 = vector.load %arg1[%c0_1, %c0_2] : memref<8x128xf32, #tpu.memory_space<vmem>>, vector<8x128xf32>
    tpu.vector_store %arg1[%c0_1, %c0_2], %1 {strides = array<i32>} : memref<8x128xf32, #tpu.memory_space<vmem>>, vector<8x128xf32>,
    return
  }
}

</mosaic_0001>

<bundles_post_ra>
// kernel: tpu_custom_call.1
= control target key start
LH: loop header
LB: loop body
LE: loop exit
PB: predicated region body
PF: predicated region fallthrough
CT: control target
= control target key end

     0   :  { %6 = vsyncpa [#allocation3], 0  ;;  %s118_s0 = inlined_call_operand.hbm [shape: f32[8,128], index: 0, kind: input, shape index: {}]   ;;  %s119_s1 = inlined_call_operand.hbm [shape: f32[8,128], index: 1, kind: output, shape index: {}]  }
   0x1   :  { %7 = vsyncpa [#allocation4], 0  ;;  %s13_s8 = sshll.u32 %s118_s0, 4  ;;  %s99_s9 = smov [#allocation2]   ;;  %s14_s8 = int_to_ptr.hbm [resolvable:$true] %s13_s8 }
   0x2   :  { %s15_s10 = sshll.u32 %s99_s9, 4  ;;  %s16_s10 = int_to_ptr.vmem [resolvable:$true] %s15_s10 }
   0x3   :  { %18 = dma.hbm_to_vmem [thread:$0]  %s14_s8, 128, %s16_s10, [#allocation3]  }
   0x4   :  { %95 = dma.done.wait [#allocation3], 128  }
   0x5   :  { %96 = vsyncadd [#allocation3], 4294967168  ;;  %v23_v0 = vld [vmem:[#allocation2] sm:$0xff]  ;;  %s100_s11 = smov 1   ;;  %s101_s12 = smov [#allocation5]  }
   0x6   :  { %24 = vrot.lane.b32.xlu0 %v23_v0, %s100_s11  ;;  %s32_s13 = sshll.u32 %s101_s12, 4  ;;  %s34_s16 = sshll.u32 %s119_s1, 4  ;;  %s33_s13 = int_to_ptr.vmem [resolvable:$true] %s32_s13  ;;  %s35_s16 = int_to_ptr.hbm [resolvable:$true] %s34_s16 }
  0x78   :  { %v25_v1 = vpop.permute.xlu0 %24 }
  0x79   :  { %26 = vst [vmem:[#allocation5] sm:$0xff] %v25_v1 }
  0x7a   :  { %37 = dma.vmem_to_hbm [thread:$0]  %s33_s13, 128, %s35_s16, [#allocation4]  }
  0x7b   :  { %97 = dma.done.wait [#allocation4], 128  }
  0x7c   :  { %98 = vsyncadd [#allocation4], 4294967168 }
  0x7d   :  { %42 = vsyncpa [#allocation3], 1 }
  0x7e   :  { %43 = vsyncpa [#allocation4], 1 }

</bundles_post_ra>
